<compile_context>
chip_gen: v5e
topology: v5e:2x2
jax: 0.10.0
libtpu: 0.0.40
codegen_flags: <defaults>
</compile_context>

<pallas_src>
import functools
import math

import jax
import jax.numpy as jnp
from jax.experimental import pallas as pl
from jax.experimental.pallas import tpu as pltpu


def _pe_kernel(frames_ref, w_ref, div_ref, phase_ref, feat_ref, out_ref):
    """One grid step = one (batch row, T-tile) block in the lane-packed layout.

    frames_ref : (1, tT, 2*pack) f32   hi || lo split of the frame indices
    w_ref      : (2*pack, Dp)    f32   {0, 1, 128} selection weights
    div_ref    : (1, Dp)         f32   per-lane frequency (div_term, tiled)
    phase_ref  : (1, Dp)         f32   0 (even dim -> sin) or pi/2 (odd -> cos)
    feat_ref   : (1, tT, Dp)     feat dtype
    out_ref    : (1, tT, Dp)     feat dtype (aliases feat's HBM buffer)
    """
    # Rebuild the per-lane frame index on the idle MXU:
    #   fr[t, l] = 128*hi[t, l // D] + lo[t, l // D] == frames[...]  (exact f32)
    fr = jnp.dot(frames_ref[0], w_ref[...],
                 preferred_element_type=jnp.float32)          # (tT, Dp)

    # cos(x) == sin(x + pi/2): one transcendental, no iota / where / select.
    ang = fr * div_ref[...] + phase_ref[...]
    pe = jnp.sin(ang)

    out_ref[...] = feat_ref[...] + pe[None, :, :].astype(out_ref.dtype)


def _choose_row_tile(tp, dp, itemsize, target_bytes=1 << 20):
    """Largest row tile (multiple of 8 dividing tp, or tp itself) whose block
    is <= ~1 MiB, keeping double-buffered in/out blocks far inside the scoped
    VMEM default on v5e/v6e/v7x."""
    if tp * dp * itemsize <= target_bytes:
        return tp
    rows = max(8, (target_bytes // (dp * itemsize)) // 8 * 8)
    rows = min(rows, tp)
    rows -= rows % 8
    while rows >= 8:
        if tp % rows == 0:
            return rows
        rows -= 8
    return tp  # no clean divisor: fall back to one block per batch row


@functools.partial(jax.jit, static_argnums=(2,))
def frame_positional_encoding(feat, frames, d_model):
    """feat: (B, T, D) float, frames: (B, T) int -> (B, T, D)."""
    B, T, D = feat.shape
    assert D == d_model and frames.shape == (B, T)
    assert D % 2 == 0, "d_model must be even (sin/cos pairs)"

    # ---- lane packing: fold `pack` consecutive frames into the 128-lane axis.
    if D < 128 and 128 % D == 0:
        pack = 128 // D
        while pack > 1 and T % pack:
            pack //= 2
    else:
        pack = 1
    Tp, Dp = T // pack, pack * D

    # ---- parameter setup (plain JAX glue), mirrors the PyTorch __init__ ----
    half = jnp.arange(0, D, 2, dtype=jnp.float32)
    div_term = jnp.exp(half * (-math.log(10000.0) / D))              # (D/2,)
    div_full = jnp.repeat(div_term, 2)                               # (D,)
    phase_full = jnp.where(jnp.arange(D) % 2 == 0, 0.0, math.pi / 2.0)
    div_t = jnp.tile(div_full, pack).reshape(1, Dp).astype(jnp.float32)
    phase_t = jnp.tile(phase_full, pack).reshape(1, Dp).astype(jnp.float32)

    # Selection weights for the in-kernel broadcast matmul:
    #   fr_wide[t, l] = 128*hi[t, l//D] + lo[t, l//D]
    # hi, lo < 128 and weights in {0, 1, 128} are bf16-exact -> exact result.
    sel = (jnp.arange(Dp) // D == jnp.arange(pack)[:, None]).astype(jnp.float32)
    w = jnp.concatenate([128.0 * sel, sel], axis=0)                  # (2*pack, Dp)

    fr_i = frames.astype(jnp.int32)                                  # frames < 16384
    hi = (fr_i // 128).astype(jnp.float32).reshape(B, Tp, pack)
    lo = (fr_i % 128).astype(jnp.float32).reshape(B, Tp, pack)
    frames_hl = jnp.concatenate([hi, lo], axis=-1)                   # (B, Tp, 2*pack)

    feat_p = feat.reshape(B, Tp, Dp)                                 # lane-dense layout
    tT = _choose_row_tile(Tp, Dp, feat.dtype.itemsize)

    out_p = pl.pallas_call(
        _pe_kernel,
        out_shape=jax.ShapeDtypeStruct((B, Tp, Dp), feat.dtype),
        grid_spec=pltpu.PrefetchScalarGridSpec(
            num_scalar_prefetch=0,
            grid=(B, Tp // tT),
            in_specs=[
                pl.BlockSpec((1, tT, 2 * pack), lambda b, t: (b, t, 0)),  # frames hi||lo
                pl.BlockSpec((2 * pack, Dp), lambda b, t: (0, 0)),        # selection W
                pl.BlockSpec((1, Dp), lambda b, t: (0, 0)),               # div (tiled)
                pl.BlockSpec((1, Dp), lambda b, t: (0, 0)),               # phase (tiled)
                pl.BlockSpec((1, tT, Dp), lambda b, t: (b, t, 0)),        # feat block
            ],
            out_specs=pl.BlockSpec((1, tT, Dp), lambda b, t: (b, t, 0)),
        ),
        compiler_params=pltpu.CompilerParams(
            dimension_semantics=("parallel", "parallel")),
        input_output_aliases={4: 0},   # out aliases feat (in-place add)
    )(frames_hl, w, div_t, phase_t, feat_p)

    return out_p.reshape(B, T, D)


def _reference(feat, frames, d_model, max_len=10000):
    """Plain-JAX replica of the PyTorch buffer + gather, for verification."""
    position = jnp.arange(max_len, dtype=jnp.float32)[:, None]
    div_term = jnp.exp(jnp.arange(0, d_model, 2, dtype=jnp.float32)
                       * (-math.log(10000.0) / d_model))
    pe = jnp.zeros((max_len, d_model), jnp.float32)
    pe = pe.at[:, 0::2].set(jnp.sin(position * div_term))
    pe = pe.at[:, 1::2].set(jnp.cos(position * div_term))
    return feat + pe[frames, :].astype(feat.dtype)


if __name__ == "__main__":
    B, T, D = 2, 32, 32
    key = jax.random.PRNGKey(0)
    k_feat, k_frames = jax.random.split(key)

    feat = jax.random.normal(k_feat, (B, T, D), dtype=jnp.float32)
    frames = jax.random.randint(k_frames, (B, T), 0, 1000, dtype=jnp.int32)

    out = frame_positional_encoding(feat, frames, D)
    out = jax.block_until_ready(out)

    ref = _reference(feat, frames, D)
    assert out.shape == (B, T, D)
    # atol 1e-4: odd dims use sin(x + pi/2) vs cos(x); the f32 rounding of the
    # phase add at angles up to ~1e3 contributes <= ~3e-5, well within 1e-4.
    assert jnp.allclose(out, ref, atol=1e-4, rtol=1e-4), (
        "mismatch vs reference: max abs err = "
        f"{float(jnp.max(jnp.abs(out - ref)))}")

    print("KERNEL_OK")
</pallas_src>

<mosaic_0001>
module attributes {stable_mosaic.version = 11 : i64} {
  func.func @_pe_kernel(%arg0: i32, %arg1: i32, %arg2: memref<1x8x8xf32, #tpu.memory_space<vmem>>, %arg3: memref<8x128xf32, #tpu.memory_space<vmem>>, %arg4: memref<1x128xf32, #tpu.memory_space<vmem>>, %arg5: memref<1x128xf32, #tpu.memory_space<vmem>>, %arg6: memref<1x8x128xf32, #tpu.memory_space<vmem>>, %arg7: memref<1x8x128xf32, #tpu.memory_space<vmem>>) attributes {dimension_semantics = [#tpu.dimension_semantics<parallel>, #tpu.dimension_semantics<parallel>], iteration_bounds = array<i64: 2, 1>, scalar_prefetch = 0 : i64, scratch_operands = 0 : i64, tpu.core_type = #tpu.core_type<tc>, window_params = [{transform_indices = @transform_0, window_bounds = array<i64: 1, 8, 8>}, {pipeline_mode = #tpu.pipeline_mode<synchronous>, transform_indices = @transform_1, window_bounds = array<i64: 8, 128>}, {pipeline_mode = #tpu.pipeline_mode<synchronous>, transform_indices = @transform_2, window_bounds = array<i64: 1, 128>}, {pipeline_mode = #tpu.pipeline_mode<synchronous>, transform_indices = @transform_3, window_bounds = array<i64: 1, 128>}, {transform_indices = @transform_4, window_bounds = array<i64: 1, 8, 128>}, {transform_indices = @transform_5, window_bounds = array<i64: 1, 8, 128>}]} {
    %c0 = arith.constant 0 : index
    %c0_0 = arith.constant 0 : index
    %c0_1 = arith.constant 0 : index
    %0 = vector.load %arg2[%c0, %c0_0, %c0_1] : memref<1x8x8xf32, #tpu.memory_space<vmem>>, vector<1x8x8xf32>
    %1 = vector.shape_cast %0 : vector<1x8x8xf32> to vector<8x8xf32>
    %c0_2 = arith.constant 0 : index
    %c0_3 = arith.constant 0 : index
    %2 = vector.load %arg3[%c0_2, %c0_3] : memref<8x128xf32, #tpu.memory_space<vmem>>, vector<8x128xf32>
    %cst = arith.constant dense<0.000000e+00> : vector<8x128xf32>
    %3 = tpu.matmul %1, %2, %cst {dimension_numbers = #tpu.dot_dimension_numbers<[1], [0], [0], [1], [0, 0, 1, 1], [], []>} : vector<8x8xf32>, vector<8x128xf32>, vector<8x128xf32> -> vector<8x128xf32>
    %c0_4 = arith.constant 0 : index
    %c0_5 = arith.constant 0 : index
    %4 = vector.load %arg4[%c0_4, %c0_5] : memref<1x128xf32, #tpu.memory_space<vmem>>, vector<1x128xf32>
    %5 = vector.broadcast %4 : vector<1x128xf32> to vector<8x128xf32>
    %6 = arith.mulf %3, %5 : vector<8x128xf32>
    %c0_6 = arith.constant 0 : index
    %c0_7 = arith.constant 0 : index
    %7 = vector.load %arg5[%c0_6, %c0_7] : memref<1x128xf32, #tpu.memory_space<vmem>>, vector<1x128xf32>
    %8 = vector.broadcast %7 : vector<1x128xf32> to vector<8x128xf32>
    %9 = arith.addf %6, %8 : vector<8x128xf32>
    %10 = math.sin %9 : vector<8x128xf32>
    %c0_8 = arith.constant 0 : index
    %c0_9 = arith.constant 0 : index
    %c0_10 = arith.constant 0 : index
    %11 = vector.load %arg6[%c0_8, %c0_9, %c0_10] : memref<1x8x128xf32, #tpu.memory_space<vmem>>, vector<1x8x128xf32>
    %12 = vector.shape_cast %10 : vector<8x128xf32> to vector<1x8x128xf32>
    %13 = arith.addf %11, %12 : vector<1x8x128xf32>
    %c0_11 = arith.constant 0 : index
    %c0_12 = arith.constant 0 : index
    %c0_13 = arith.constant 0 : index
    %14 = vector.load %arg7[%c0_11, %c0_12, %c0_13] : memref<1x8x128xf32, #tpu.memory_space<vmem>>, vector<1x8x128xf32>
    tpu.vector_store %arg7[%c0_11, %c0_12, %c0_13], %13 {strides = array<i32>} : memref<1x8x128xf32, #tpu.memory_space<vmem>>, vector<1x8x128xf32>,
    return
  }
  func.func @transform_0(%arg0: i32, %arg1: i32) -> (i32, i32, i32) {
    %c0_i32 = arith.constant 0 : i32
    %c0_i32_0 = arith.constant 0 : i32
    return %arg0, %arg1, %c0_i32 : i32, i32, i32
  }
  func.func @transform_1(%arg0: i32, %arg1: i32) -> (i32, i32) {
    %c0_i32 = arith.constant 0 : i32
    %c0_i32_0 = arith.constant 0 : i32
    %c0_i32_1 = arith.constant 0 : i32
    return %c0_i32, %c0_i32_0 : i32, i32
  }
  func.func @transform_2(%arg0: i32, %arg1: i32) -> (i32, i32) {
    %c0_i32 = arith.constant 0 : i32
    %c0_i32_0 = arith.constant 0 : i32
    %c0_i32_1 = arith.constant 0 : i32
    return %c0_i32, %c0_i32_0 : i32, i32
  }
  func.func @transform_3(%arg0: i32, %arg1: i32) -> (i32, i32) {
    %c0_i32 = arith.constant 0 : i32
    %c0_i32_0 = arith.constant 0 : i32
    %c0_i32_1 = arith.constant 0 : i32
    return %c0_i32, %c0_i32_0 : i32, i32
  }
  func.func @transform_4(%arg0: i32, %arg1: i32) -> (i32, i32, i32) {
    %c0_i32 = arith.constant 0 : i32
    %c0_i32_0 = arith.constant 0 : i32
    return %arg0, %arg1, %c0_i32 : i32, i32, i32
  }
  func.func @transform_5(%arg0: i32, %arg1: i32) -> (i32, i32, i32) {
    %c0_i32 = arith.constant 0 : i32
    %c0_i32_0 = arith.constant 0 : i32
    return %arg0, %arg1, %c0_i32 : i32, i32, i32
  }
}

</mosaic_0001>

<bundles_post_ra>
// kernel: tile.16
= control target key start
LH: loop header
LB: loop body
LE: loop exit
PB: predicated region body
PF: predicated region fallthrough
CT: control target
= control target key end

     0   :  { %s22_s0 = inlined_call_operand.vmem [shape: f32[32], index: 0, kind: input, shape index: {}]   ;;  %s23_s1 = inlined_call_operand.vmem [shape: f32[4,32], index: 1, kind: output, shape index: {}]  }
   0x1   :  { %v4_v0 = vld [vmem:[%s22_s0] ss:$0 sm:$0xff] }
   0x2   :  { %5 = vst [vmem:[%s23_s1] sm:$0xf] %v4_v0 }

// kernel: tile.17
= control target key start
LH: loop header
LB: loop body
LE: loop exit
PB: predicated region body
PF: predicated region fallthrough
CT: control target
= control target key end

     0   :  { %s37_s8 = smov 32   ;;  %s38_s9 = smov 64   ;;  %vm7_vm0 = vcmask 261120   ;;  %vm13_vm1 = vcmask 1048320   ;;  %vm19_vm2 = vcmask 785920   ;;  %vm25_vm3 = vcmask 523520   ;;  %s55_s0 = inlined_call_operand.vmem [shape: f32[4,32], index: 0, kind: input, shape index: {}]   ;;  %s56_s1 = inlined_call_operand.vmem [shape: f32[1,128], index: 1, kind: output, shape index: {}]  }
   0x1   :  { %v4_v0 = vld [vmem:[%s55_s0] sm:$0xf]  ;;  %s36_s0 = smov 96  }
   0x2   :  { %5 = vst [vmem:[#allocation1] sm:$0xf] %v4_v0 }
   0x9   :  { %v10_v1 = vld [vmem:[#allocation1 + $0x3] sm:$0x1]   ;;  %v22_v2 = vld [vmem:[#allocation1 + $0x1] sm:$0x1]   ;;  %v16_v3 = vld [vmem:[#allocation1 + $0x2] sm:$0x1]  }
   0xa   :  { %11 = vrot.lane.b32.xlu0 %v10_v1, %s36_s0  ;;  %23 = vrot.lane.b32.xlu1 %v22_v2, %s37_s8  ;;  %v6_v4 = vld [vmem:[#allocation1] sm:$0x1]  }
   0xb   :  { %8 = vst.msk [vmem:[#allocation0] sm:$0x1] %vm7_vm0, %v6_v4  }
  0x12   :  { %17 = vrot.lane.b32.xlu0 %v16_v3, %s38_s9 }
  0x7c   :  { %v12_v5 = vpop.permute.xlu0 %11   ;;  %v24_v6 = vpop.permute.xlu1 %23  }
  0x7d   :  { %14 = vst.msk [vmem:[#allocation0] sm:$0x1] %vm13_vm1, %v12_v5  }
  0x84   :  { %v18_v7 = vpop.permute.xlu0 %17  }
  0x85   :  { %20 = vst.msk [vmem:[#allocation0] sm:$0x1] %vm19_vm2, %v18_v7  }
  0x86   :  { %26 = vst.msk [vmem:[#allocation0] sm:$0x1] %vm25_vm3, %v24_v6  }
  0x8d   :  { %v29_v8 = vld [vmem:[#allocation0] sm:$0x1] }
  0x8e   :  { %32 = vst [vmem:[%s56_s1] sm:$0x1] %v29_v8 }

// kernel: tile.10
= control target key start
LH: loop header
LB: loop body
LE: loop exit
PB: predicated region body
PF: predicated region fallthrough
CT: control target
= control target key end

     0   :  { %s131_s10 = smov 30   ;;  %s132_s11 = smov 26   ;;  %vm3_vm0 = vcmask 15360   ;;  %vm9_vm1 = vcmask 261360   ;;  %vm15_vm2 = vcmask 244960   ;;  %vm21_vm3 = vcmask 228560   ;;  %s207_s0 = inlined_call_operand.vmem [shape: f32[16,2], index: 0, kind: input, shape index: {}]   ;;  %s208_s1 = inlined_call_operand.vmem [shape: f32[32], index: 1, kind: output, shape index: {}]  }
   0x1   :  { %v101_v0 = vld [vmem:[%s207_s0 + $0xf] sm:$0x1]   ;;  %v103_v1 = vld [vmem:[%s207_s0 + $0xd] sm:$0x1]   ;;  %v105_v2 = vld [vmem:[%s207_s0 + $0xb] sm:$0x1]  }
   0x2   :  { %7 = vrot.lane.b32.xlu0 %v101_v0, %s131_s10  ;;  %19 = vrot.lane.b32.xlu1 %v103_v1, %s132_s11  ;;  %s133_s14 = smov 22   ;;  %v102_v3 = vld [vmem:[%s207_s0 + $0xe] sm:$0x1]   ;;  %v104_v4 = vld [vmem:[%s207_s0 + $0xc] sm:$0x1]   ;;  %s134_s19 = smov 28  }
   0x3   :  { %31 = vrot.lane.b32.xlu2 %v105_v2, %s133_s14  ;;  %s135_s20 = smov 24   ;;  %v106_v5 = vld [vmem:[%s207_s0 + $0xa] sm:$0x1]   ;;  %s136_s23 = smov 20   ;;  %v107_v6 = vld [vmem:[%s207_s0 + $0x9] sm:$0x1]  }
   0x4   :  { %v108_v7 = vld [vmem:[%s207_s0 + $0x8] sm:$0x1]   ;;  %s137_s28 = smov 18   ;;  %s138_s29 = smov 16   ;;  %v109_v8 = vld [vmem:[%s207_s0 + $0x7] sm:$0x1]  }
   0x5   :  { %s139_s3 = smov 14   ;;  %v110_v9 = vld [vmem:[%s207_s0 + $0x6] sm:$0x1]   ;;  %v111_v10 = vld [vmem:[%s207_s0 + $0x5] sm:$0x1]   ;;  %s140_s8 = smov 12  }
   0x6   :  { %s141_s9 = smov 10   ;;  %v112_v11 = vld [vmem:[%s207_s0 + $0x4] sm:$0x1]   ;;  %s142_s12 = smov 8   ;;  %v113_v12 = vld [vmem:[%s207_s0 + $0x3] sm:$0x1]  }
   0x7   :  { %v114_v13 = vld [vmem:[%s207_s0 + $0x2] sm:$0x1]   ;;  %s143_s17 = smov 6   ;;  %s144_s18 = smov 4   ;;  %v115_v14 = vld [vmem:[%s207_s0 + $0x1] sm:$0x1]  }
   0x8   :  { %s145_s21 = smov 2   ;;  %v2_v15 = vld [vmem:[%s207_s0] sm:$0x1]   ;;  %vm27_vm4 = vcmask 212160   ;;  %vm33_vm5 = vcmask 195760   ;;  %vm39_vm6 = vcmask 179360  }
   0x9   :  { %4 = vst.msk [vmem:[#allocation0] sm:$0x1] %vm3_vm0, %v2_v15   ;;  %vm45_vm7 = vcmask 162960   ;;  %vm51_vm8 = vcmask 146560   ;;  %vm57_vm9 = vcmask 130160   ;;  %vm63_vm10 = vcmask 113760  }
   0xa   :  { %13 = vrot.lane.b32.xlu0 %v102_v3, %s134_s19  ;;  %25 = vrot.lane.b32.xlu1 %v104_v4, %s135_s20  ;;  %vm69_vm11 = vcmask 97360   ;;  %vm75_vm12 = vcmask 80960   ;;  %vm81_vm13 = vcmask 64560   ;;  %vm87_vm14 = vcmask 48160  }
   0xb   :  { %37 = vrot.lane.b32.xlu2 %v106_v5, %s136_s23  ;;  %vm93_vm15 = vcmask 31760  }
  0x12   :  { %43 = vrot.lane.b32.xlu0 %v107_v6, %s137_s28  ;;  %49 = vrot.lane.b32.xlu1 %v108_v7, %s138_s29 }
  0x13   :  { %55 = vrot.lane.b32.xlu2 %v109_v8, %s139_s3 }
  0x1a   :  { %61 = vrot.lane.b32.xlu0 %v110_v9, %s140_s8  ;;  %67 = vrot.lane.b32.xlu1 %v111_v10, %s141_s9 }
  0x1b   :  { %73 = vrot.lane.b32.xlu2 %v112_v11, %s142_s12 }
  0x22   :  { %79 = vrot.lane.b32.xlu0 %v113_v12, %s143_s17  ;;  %85 = vrot.lane.b32.xlu1 %v114_v13, %s144_s18 }
  0x23   :  { %91 = vrot.lane.b32.xlu2 %v115_v14, %s145_s21 }
  0x5d   :  { %v32_v16 = vpop.permute.xlu2 %31  }
  0x65   :  { %v38_v17 = vpop.permute.xlu2 %37  }
  0x6d   :  { %v56_v18 = vpop.permute.xlu2 %55  }
  0x74   :  { %v8_v19 = vpop.permute.xlu0 %7   ;;  %v20_v20 = vpop.permute.xlu1 %19  }
  0x75   :  { %10 = vst.msk [vmem:[#allocation0] sm:$0x1] %vm9_vm1, %v8_v19   ;;  %v74_v21 = vpop.permute.xlu2 %73  }
  0x7c   :  { %v14_v22 = vpop.permute.xlu0 %13   ;;  %v26_v23 = vpop.permute.xlu1 %25  }
  0x7d   :  { %16 = vst.msk [vmem:[#allocation0] sm:$0x1] %vm15_vm2, %v14_v22   ;;  %v92_v24 = vpop.permute.xlu2 %91  }
  0x7e   :  { %22 = vst.msk [vmem:[#allocation0] sm:$0x1] %vm21_vm3, %v20_v20  }
  0x7f   :  { %28 = vst.msk [vmem:[#allocation0] sm:$0x1] %vm27_vm4, %v26_v23  }
  0x80   :  { %34 = vst.msk [vmem:[#allocation0] sm:$0x1] %vm33_vm5, %v32_v16  }
  0x81   :  { %40 = vst.msk [vmem:[#allocation0] sm:$0x1] %vm39_vm6, %v38_v17  }
  0x84   :  { %v44_v25 = vpop.permute.xlu0 %43   ;;  %v50_v26 = vpop.permute.xlu1 %49  }
  0x85   :  { %46 = vst.msk [vmem:[#allocation0] sm:$0x1] %vm45_vm7, %v44_v25  }
  0x86   :  { %52 = vst.msk [vmem:[#allocation0] sm:$0x1] %vm51_vm8, %v50_v26  }
  0x87   :  { %58 = vst.msk [vmem:[#allocation0] sm:$0x1] %vm57_vm9, %v56_v18  }
  0x8c   :  { %v62_v27 = vpop.permute.xlu0 %61   ;;  %v68_v28 = vpop.permute.xlu1 %67  }
  0x8d   :  { %64 = vst.msk [vmem:[#allocation0] sm:$0x1] %vm63_vm10, %v62_v27  }
  0x8e   :  { %70 = vst.msk [vmem:[#allocation0] sm:$0x1] %vm69_vm11, %v68_v28  }
  0x8f   :  { %76 = vst.msk [vmem:[#allocation0] sm:$0x1] %vm75_vm12, %v74_v21  }
  0x94   :  { %v80_v29 = vpop.permute.xlu0 %79   ;;  %v86_v30 = vpop.permute.xlu1 %85  }
  0x95   :  { %82 = vst.msk [vmem:[#allocation0] sm:$0x1] %vm81_vm13, %v80_v29  }
  0x96   :  { %88 = vst.msk [vmem:[#allocation0] sm:$0x1] %vm87_vm14, %v86_v30  }
  0x97   :  { %94 = vst.msk [vmem:[#allocation0] sm:$0x1] %vm93_vm15, %v92_v24  }
  0x9e   :  { %v97_v31 = vld [vmem:[#allocation0] sm:$0x1] }
  0x9f   :  { %100 = vst [vmem:[%s208_s1] sm:$0x1] %v97_v31 }

// kernel: frame_positional_encoding.1
= control target key start
LH: loop header
LB: loop body
LE: loop exit
PB: predicated region body
PF: predicated region fallthrough
CT: control target
= control target key end

     0   :  { %s670_s18 = smov 0   ;;  %s672_s19 = smov 0   ;;  %s776_s0 = inlined_call_operand.vmem [shape: f32[2,8,8], index: 0, kind: input, shape index: {}]   ;;  %s777_s1 = inlined_call_operand.vmem [shape: f32[8,128], index: 1, kind: input, shape index: {}]   ;;  %s778_s2 = inlined_call_operand.vmem [shape: f32[1,128], index: 2, kind: input, shape index: {}]   ;;  %s779_s3 = inlined_call_operand.vmem [shape: f32[1,128], index: 3, kind: input, shape index: {}]   ;;  %s780_s4 = inlined_call_operand.vmem [shape: f32[2,8,128], index: 4, kind: input, shape index: {}, may-alias: {4,5}]   ;;  %s781_s5 = inlined_call_operand.vmem [shape: f32[2,8,128], index: 5, kind: output, shape index: {}, may-alias: {4,5}]  }
   0x1   :  { %s674_s20 = smov 0  }
   0x2 LB: > { %s27_s21 = sadd.s32 1, %s627_s19  ;;  %p566_p0 = scmp.ge.s32.totalorder %s631_s20, 1  ;;  %s631_s20 = sphi %s674_s20, %s15_s20   ;;  %s627_s19 = sphi %s672_s19, %s783_s19   ;;  %s623_s18 = sphi %s670_s18, %s782_s18  }
   0x3   : > { %p29_p1 = scmp.ge.s32.totalorder %s27_s21, 2  ;;  %p219_p2 = scmp.lt.s32.totalorder %s631_s20, 3 }
   0x5   : > { %s785_s21 = smov (%p29_p1, %s27_s21), 0  ;;  %p220_p3 = pnand %p566_p0, %p219_p2 }
   0x6   : > { %p258_p4 = scmp.lt.s32.totalorder (!%p220_p3), %s623_s18, 1 }
   0x7   : > { %223 = sbr.rel (%p220_p3) target bundleno = 245 (0xf5), region = 40 }
   0xc   : > { %v280_v0 = vld [vmem:[%s777_s1] sm:$0xff]  ;;  %s787_s18 = smov (!%p258_p4, %s623_s18), 1  ;;  %vm281_vm0 = vcmask 64512   ;;  %v633_v18 = vmov 683565275  }
   0xd   : > { %300 = vmatpush.msra.mxu0 %v280_v0  ;;  %s691_s24 = sshll.u32 %s787_s18, 3  ;;  %v607_v2 = vld [vmem:[%s778_s2] ss:$0 sm:$0xff]  ;;  %v634_v20 = vmov 2475754826  }
   0xe   : > { %s264_s27 = scalar_lea.vmem %s776_s0, %s691_s24  ;;  %v608_v3 = vld [vmem:[%s779_s3] ss:$0 sm:$0xff]  ;;  %v635_v23 = vmov 2131351028   ;;  %v636_v26 = vmov 2102212464   ;;  %s271_s9 = scalar_lea.vmem %s780_s4, %s691_s24 }
   0xf   : > { %v279_v1 = vld [vmem:[%s264_s27] sm:$0xff]  ;;  %v637_v29 = vmov 920167782   ;;  %v638_v32 = vmov 1326507024   ;;  %s278_s12 = scalar_lea.vmem %s781_s5, %s691_s24 }
  0x10   : > { %570 = vmatmul.msk.f32.vlgmr.msra.gmra.mxu0 %vm281_vm0, %v279_v1 }
  0x8d   : > { %v302_v4 = vpop.f32.mrf.mxu0 }
  0x8e   : > { %v309_v5 = vmul.f32 %v607_v2, %v302_v4  ;;  %v639_v2 = vmov 0  }
  0x90   : > { %v703_v6 = vadd.f32 %v608_v3, %v309_v5 }
  0x92   : > { %v318_v7 = vand.u32 2139095040, %v703_v6  ;;  %v315_v10 = vand.u32 2147483647, %v703_v6  ;;  %vm317_vm13 = vcmp.lt.s32.totalorder %v703_v6, 0 }
  0x94   : > { %v319_v8 = vshrl.u32 %v318_v7, 23  ;;  %v322_v12 = vand.u32 8388607, %v315_v10  ;;  %vm316_vm14 = vcmp.le.f32.partialorder %v315_v10, 0.7853982 }
  0x96   : > { %v571_v9 = vadd.s32 4294967169, %v319_v8  ;;  %v323_v16 = vor.u32 8388608, %v322_v12 }
  0x98   : > { %v325_v11 = vadd.s32 1, %v571_v9  ;;  %v720_v39 = vshll.u32 %v323_v16, 8 }
  0x9a   : > { %vm326_vm1 = vcmp.gt.s32.totalorder %v325_v11, 0  ;;  %v364_v48 = vand.u32 65535, %v720_v39  ;;  %v365_v49 = vshrl.u32 %v720_v39, 16 }
  0x9b   : > { %v327_v13 = vsel %vm326_vm1, %v325_v11, 0 }
  0x9c   : > { %v329_v14 = vand.u32 31, %v327_v13  ;;  %v711_v17 = vshrl.u32 %v327_v13, 5 }
  0x9e   : > { %v709_v15 = vsub.s32 32, %v329_v14  ;;  %v332_v19 = vshll.u32 %v633_v18, %v329_v14  ;;  %v335_v21 = vshll.u32 %v634_v20, %v329_v14  ;;  %v338_v25 = vshll.u32 %v635_v23, %v329_v14 }
  0x9f   : > { %v341_v28 = vshll.u32 %v636_v26, %v329_v14  ;;  %v344_v31 = vshll.u32 %v637_v29, %v329_v14  ;;  %vm347_vm2 = vcmp.lt.s32.totalorder %v711_v17, 1  ;;  %vm350_vm3 = vcmp.lt.s32.totalorder %v711_v17, 4 }
  0xa0   : > { %v333_v22 = vshrl.u32 %v634_v20, %v709_v15  ;;  %v336_v24 = vshrl.u32 %v635_v23, %v709_v15  ;;  %v339_v27 = vshrl.u32 %v636_v26, %v709_v15  ;;  %v342_v30 = vshrl.u32 %v637_v29, %v709_v15 }
  0xa1   : > { %v345_v33 = vshrl.u32 %v638_v32, %v709_v15  ;;  %vm349_vm4 = vcmp.lt.s32.totalorder %v711_v17, 3  ;;  %vm348_vm5 = vcmp.lt.s32.totalorder %v711_v17, 2  ;;  %v331_v13 = vshrl.u32 %v633_v18, %v709_v15 }
  0xa2   : > { %v334_v34 = vor.u32 %v333_v22, %v332_v19  ;;  %v337_v35 = vor.u32 %v336_v24, %v335_v21  ;;  %v340_v36 = vor.u32 %v339_v27, %v338_v25  ;;  %v343_v37 = vor.u32 %v342_v30, %v341_v28 }
  0xa3   : > { %v346_v38 = vor.u32 %v345_v33, %v344_v31 }
  0xa4   : > { %v355_v40 = vsel %vm347_vm2, %v334_v34, %v337_v35  ;;  %v359_v41 = vsel %vm347_vm2, %v337_v35, %v340_v36  ;;  %v356_v42 = vsel %vm350_vm3, %v343_v37, 920167782  ;;  %v352_v9 = vsel %vm350_vm3, %v340_v36, 2102212464 }
  0xa5   : > { %v360_v43 = vsel %vm350_vm3, %v346_v38, 1326507024  ;;  %v357_v44 = vsel %vm349_vm4, %v340_v36, %v356_v42  ;;  %v351_v22 = vsel %vm347_vm2, %v331_v13, %v334_v34  ;;  %v353_v23 = vsel %vm349_vm4, %v337_v35, %v352_v9 }
  0xa6   : > { %v361_v45 = vsel %vm349_vm4, %v343_v37, %v360_v43  ;;  %v358_v46 = vsel %vm348_vm5, %v355_v40, %v357_v44  ;;  %v354_v15 = vsel %vm348_vm5, %v351_v22, %v353_v23  ;;  %vm458_vm2 = vweird.f32 %v703_v6 }
  0xa7   : > { %v362_v47 = vsel %vm348_vm5, %v359_v41, %v361_v45  ;;  %v388_v52 = vand.u32 65535, %v358_v46  ;;  %v389_v53 = vshrl.u32 %v358_v46, 16  ;;  %v408_v31 = vmul.u32 %v720_v39, %v354_v15 }
  0xa8   : > { %v366_v50 = vand.u32 65535, %v362_v47  ;;  %v367_v51 = vshrl.u32 %v362_v47, 16 }
  0xa9   : > { %v391_v56 = vmul.u32 %v389_v53, %v364_v48  ;;  %v392_v57 = vmul.u32 %v388_v52, %v365_v49  ;;  %v390_v61 = vmul.u32 %v388_v52, %v364_v48  ;;  %v393_v1 = vmul.u32 %v389_v53, %v365_v49 }
  0xaa   : > { %v369_v54 = vmul.u32 %v367_v51, %v364_v48  ;;  %v370_v55 = vmul.u32 %v366_v50, %v365_v49  ;;  %v368_v58 = vmul.u32 %v366_v50, %v364_v48  ;;  %v371_v60 = vmul.u32 %v367_v51, %v365_v49 }
  0xab   : > { %v394_v62 = vshll.u32 %v391_v56, 16  ;;  %v396_v4 = vshll.u32 %v392_v57, 16  ;;  %v395_v20 = vshrl.u32 %v391_v56, 16  ;;  %v397_v26 = vshrl.u32 %v392_v57, 16 }
  0xac   : > { %v372_v59 = vshll.u32 %v369_v54, 16  ;;  %v374_v63 = vshll.u32 %v370_v55, 16  ;;  %v373_v14 = vshrl.u32 %v369_v54, 16  ;;  %v375_v24 = vshrl.u32 %v370_v55, 16 }
  0xad   : > { %vm398_vm7 = vc.u32 %v390_v61, %v394_v62  ;;  %v400_v5 = vadd.s32 %v394_v62, %v390_v61 }
  0xae   : > { %vm376_vm6 = vc.u32 %v368_v58, %v372_v59  ;;  %v378_v0 = vadd.s32 %v372_v59, %v368_v58  ;;  %v399_v8 = vsel %vm398_vm7, 1, %v639_v2 }
  0xaf   : > { %v377_v3 = vsel %vm376_vm6, 1, %v639_v2  ;;  %v401_v12 = vadd.s32 %v399_v8, %v393_v1  ;;  %vm402_vm9 = vc.u32 %v400_v5, %v396_v4  ;;  %v404_v29 = vadd.s32 %v400_v5, %v396_v4 }
  0xb0   : > { %v379_v7 = vadd.s32 %v377_v3, %v371_v60  ;;  %vm380_vm8 = vc.u32 %v378_v0, %v374_v63  ;;  %v403_v19 = vsel %vm402_vm9, 1, %v639_v2 }
  0xb1   : > { %v381_v11 = vsel %vm380_vm8, 1, %v639_v2  ;;  %v405_v21 = vadd.s32 %v403_v19, %v401_v12 }
  0xb2   : > { %v383_v16 = vadd.s32 %v381_v11, %v379_v7 }
  0xb3   : > { %v406_v27 = vadd.s32 %v405_v21, %v395_v20 }
  0xb4   : > { %v384_v25 = vadd.s32 %v383_v16, %v373_v14  ;;  %v470_v16 = vld [vmem:[%s271_s9] sm:$0xff] }
  0xb5   : > { %v407_v18 = vadd.s32 %v406_v27, %v397_v26 }
  0xb6   : > { %v385_v28 = vadd.s32 %v384_v25, %v375_v24 }
  0xb7   : > { %v411_v30 = vadd.s32 1, %v407_v18 }
  0xb8   : > { %vm410_vm10 = vc.u32 %v385_v28, %v404_v29  ;;  %v409_v17 = vadd.s32 %v404_v29, %v385_v28 }
  0xb9   : > { %v412_v32 = vsel %vm410_vm10, %v411_v30, %v407_v18 }
  0xba   : > { %v413_v33 = vadd.s32 %v412_v32, %v408_v31 }
  0xbc   : > { %v414_v34 = vadd.s32 536870912, %v413_v33 }
  0xbe   : > { %v415_v36 = vshrl.u32 %v414_v34, 30 }
  0xc0   : > { %v416_v37 = vshll.u32 %v415_v36, 30  ;;  %v439_v56 = vsub.s32 4, %v415_v36 }
  0xc2   : > { %v417_v35 = vsub.s32 %v413_v33, %v416_v37  ;;  %v440_v61 = vsel %vm317_vm13, %v439_v56, %v415_v36 }
  0xc3   : > { %v442_v0 = vsel %vm316_vm14, 0, %v440_v61 }
  0xc4   : > { %vm418_vm11 = vcmp.lt.s32.totalorder %v417_v35, 0  ;;  %v419_v38 = vsub.s32 0, %v417_v35  ;;  %v459_v5 = vadd.s32 3, %v442_v0 }
  0xc6   : > { %v420_v40 = vsel %vm418_vm11, %v419_v38, %v417_v35  ;;  %v460_v11 = vand.u32 3, %v459_v5 }
  0xc7   : > { %v421_v41 = vclz %v420_v40 }
  0xc8   : > { %vm462_vm15 = vcmp.eq.s32.totalorder %v460_v11, 0  ;;  %vm465_vm0 = vcmp.eq.s32.totalorder %v460_v11, 2  ;;  %vm461_vm1 = vcmp.lt.s32.totalorder %v460_v11, 2 }
  0xc9   : > { %v572_v42 = vadd.s32 4294967294, %v421_v41 }
  0xcb   : > { %vm573_vm12 = vcmp.lt.s32.totalorder %v572_v42, 0 }
  0xcc   : > { %v424_v43 = vsel %vm573_vm12, 0, %v572_v42 }
  0xcd   : > { %v425_v44 = vsub.s32 32, %v424_v43  ;;  %v429_v45 = vsub.s32 4294967266, %v424_v43  ;;  %v426_v46 = vshll.u32 %v417_v35, %v424_v43 }
  0xcf   : > { %v427_v47 = vshrl.u32 %v409_v17, %v425_v44  ;;  %v430_v48 = vadd.s32 127, %v429_v45 }
  0xd1   : > { %v428_v39 = vor.u32 %v427_v47, %v426_v46  ;;  %v431_v49 = vshll.u32 %v430_v48, 23 }
  0xd3   : > { %v432_v50 = vor.u32 4788187, %v431_v49  ;;  %v435_v52 = vcvt.s32.f32 %v428_v39 }
  0xd5   : > { %v433_v51 = vand.u32 2147483647, %v432_v50 }
  0xd7   : > { %v436_v53 = vmul.f32 %v435_v52, %v433_v51 }
  0xd9   : > { %v437_v54 = vxor.u32 2147483648, %v436_v53 }
  0xdb   : > { %v438_v55 = vsel %vm317_vm13, %v437_v54, %v436_v53 }
  0xdc   : > { %v441_v57 = vsel %vm316_vm14, %v703_v6, %v438_v55 }
  0xdd   : > { %v443_v58 = vmul.f32 %v441_v57, %v441_v57 }
  0xdf   : > { %v444_v59 = vmul.f32 -0.001358992, %v443_v58  ;;  %v451_v60 = vmul.f32 -0.00019511016, %v443_v58 }
  0xe1   : > { %v445_v62 = vadd.f32 0.041655596, %v444_v59  ;;  %v452_v63 = vadd.f32 0.008332121, %v451_v60 }
  0xe3   : > { %v446_v1 = vmul.f32 %v445_v62, %v443_v58  ;;  %v453_v2 = vmul.f32 %v452_v63, %v443_v58 }
  0xe5   : > { %v447_v3 = vadd.f32 -0.4999988, %v446_v1  ;;  %v454_v4 = vadd.f32 -0.16666654, %v453_v2 }
  0xe7   : > { %v448_v7 = vmul.f32 %v447_v3, %v443_v58  ;;  %v455_v8 = vmul.f32 %v454_v4, %v443_v58 }
  0xe9   : > { %v449_v10 = vadd.f32 1.0, %v448_v7  ;;  %v456_v9 = vadd.f32 1.0, %v455_v8 }
  0xeb   : > { %v457_v12 = vmul.f32 %v456_v9, %v441_v57  ;;  %v466_v13 = vxor.u32 2147483648, %v449_v10 }
  0xed   : > { %v463_v14 = vxor.u32 2147483648, %v457_v12  ;;  %v467_v20 = vsel %vm465_vm0, %v466_v13, %v457_v12 }
  0xef   : > { %v464_v19 = vsel %vm462_vm15, %v449_v10, %v463_v14 }
  0xf0   : > { %v468_v21 = vsel %vm461_vm1, %v464_v19, %v467_v20 }
  0xf1   : > { %v469_v22 = vsel %vm458_vm2, nan, %v468_v21 }
  0xf2   : > { %v471_v23 = vadd.f32 %v470_v16, %v469_v22 }
  0xf4   : > { %472 = vst [vmem:[%s278_s12] sm:$0xff] %v471_v23 }
  0xf5 PF: > { %s15_s20 = sadd.s32 1, %s631_s20   ;;  %s782_s18 = smov %s627_s19 }
  0xf6   : > { %p12_p5 = scmp.ge.s32.totalorder %s15_s20, 4   ;;  %s783_s19 = smov %s785_s21 }
  0xf8   :  { %14 = sbr.rel (!%p12_p5) target bundleno = 2 (0x2), region = 73 }

</bundles_post_ra>
